<compile_context>
chip_gen: v6e
topology: v6e:2x2x1
jax: 0.10.0
libtpu: 0.0.40
codegen_flags: <defaults>
</compile_context>

<pallas_src>
import jax
import jax.numpy as jnp
from jax.experimental import pallas as pl
from jax.experimental.pallas import tpu as pltpu


# ----------------------------- Pallas kernel -------------------------------

def _conv1x1_bn_relu_kernel(xm_ref, xn_ref, wm_ref, wn_ref, bias_ref, o_ref):
    # xm_ref: (1, Cm, bm) bf16     xn_ref: (1, Cn, bm) bf16
    # wm_ref: (Cout, Cm) bf16      wn_ref: (Cout, Cn) bf16   (BN scale folded in)
    # bias_ref: (Cout, 1) f32      o_ref: (1, Cout, bm)
    xm = xm_ref[0]
    xn = xn_ref[0]
    acc = jnp.dot(wm_ref[...], xm, preferred_element_type=jnp.float32)
    acc = acc + jnp.dot(wn_ref[...], xn, preferred_element_type=jnp.float32)
    y = acc + bias_ref[...]                       # broadcast (Cout,1) over lanes
    o_ref[0] = jnp.maximum(y, 0.0).astype(o_ref.dtype)


def _choose_bm(M):
    """Pick a lane-aligned block along M; returns (bm, padded_M)."""
    for cand in (2048, 1024, 512, 256):
        if M % cand == 0:
            return cand, M
    if M <= 2048:
        return M, M                                # tiny level: single full block
    m_pad = ((M + 511) // 512) * 512               # large ragged M: pad + tile
    return 512, m_pad


def conv1x1_bn_relu(xm3, xn3, wTm, wTn, bias, out_dtype=jnp.float32):
    """xm3: (N, Cm, M) bf16, xn3: (N, Cn, M) bf16, wT*: (Cout, C*) bf16, bias: (Cout, 1) f32."""
    N, Cm, M = xm3.shape
    Cn = xn3.shape[1]
    Cout = wTm.shape[0]
    bm, m_pad = _choose_bm(M)
    if m_pad != M:
        pad = m_pad - M
        xm3 = jnp.pad(xm3, ((0, 0), (0, 0), (0, pad)))
        xn3 = jnp.pad(xn3, ((0, 0), (0, 0), (0, pad)))

    grid = (N, m_pad // bm)
    y = pl.pallas_call(
        _conv1x1_bn_relu_kernel,
        out_shape=jax.ShapeDtypeStruct((N, Cout, m_pad), out_dtype),
        grid_spec=pltpu.PrefetchScalarGridSpec(
            num_scalar_prefetch=0,
            grid=grid,
            in_specs=[
                pl.BlockSpec((1, Cm, bm), lambda n, j: (n, 0, j)),
                pl.BlockSpec((1, Cn, bm), lambda n, j: (n, 0, j)),
                pl.BlockSpec((Cout, Cm), lambda n, j: (0, 0)),
                pl.BlockSpec((Cout, Cn), lambda n, j: (0, 0)),
                pl.BlockSpec((Cout, 1), lambda n, j: (0, 0)),
            ],
            out_specs=pl.BlockSpec((1, Cout, bm), lambda n, j: (n, 0, j)),
        ),
        compiler_params=pltpu.CompilerParams(
            dimension_semantics=("parallel", "parallel")),
    )(xm3, xn3, wTm, wTn, bias)
    if m_pad != M:
        y = y[:, :, :M]
    return y


# ------------------------------- JAX glue -----------------------------------

def nearest_resize_nchw(x, size):
    """F.interpolate(x, size=size, mode='nearest') for NCHW (PyTorch floor rule)."""
    N, C, H, W = x.shape
    oh, ow = size
    if (oh, ow) == (H, W):
        return x
    if oh % H == 0 and ow % W == 0:                 # integer upsample: repeat
        rh, rw = oh // H, ow // W
        y = jnp.broadcast_to(x[:, :, :, None, :, None], (N, C, H, rh, W, rw))
        return y.reshape(N, C, oh, ow)
    if H % oh == 0 and W % ow == 0:                 # integer downsample: stride
        rh, rw = H // oh, W // ow
        return x[:, :, ::rh, ::rw]
    # general fallback (gather)
    hi = jnp.minimum(jnp.arange(oh) * H // oh, H - 1)
    wi = jnp.minimum(jnp.arange(ow) * W // ow, W - 1)
    return x[:, :, hi[:, None], wi[None, :]]


def cat_adaptive_apply(f_m, f_n, params):
    """Cat_adaptive.forward: resize f_n -> f_m spatial, (implicit) cat on C, 1x1 conv+BN+ReLU."""
    N, Cm, H, W = f_m.shape
    f_n_r = nearest_resize_nchw(f_n, (H, W))
    Cn = f_n_r.shape[1]
    M = H * W
    xm = f_m.reshape(N, Cm, M).astype(jnp.bfloat16)         # free reshapes, no transpose
    xn = f_n_r.reshape(N, Cn, M).astype(jnp.bfloat16)
    y = conv1x1_bn_relu(xm, xn, params["wTm"], params["wTn"], params["bias"])
    Cout = params["wTm"].shape[0]
    return y.reshape(N, Cout, H, W)


def make_cat_adaptive_params(key, n_fi, n_fo, eps=1e-5):
    """ConvModule(n_fi + n_fo, n_fo, k=1, bias=False) + BN(n_fo) + ReLU, eval mode.

    Returns weights already transposed to (Cout, Cin), split along the cat
    boundary (f_m has n_fo channels, f_n has n_fi channels in Cat_wo_sf usage),
    with the BN scale folded in, stored in bf16.
    """
    cin, cout = n_fi + n_fo, n_fo
    c_fm = n_fo                                         # channels of f_m in the cat
    k_w, k_g, k_b = jax.random.split(key, 3)
    bound = (6.0 / (cin + cout)) ** 0.5                 # xavier_init(uniform)
    w = jax.random.uniform(k_w, (cin, cout), jnp.float32, -bound, bound)
    gamma = jax.random.uniform(k_g, (cout,), jnp.float32, 0.5, 1.5)
    beta = 0.1 * jax.random.normal(k_b, (cout,), jnp.float32)
    running_mean = jnp.zeros((cout,), jnp.float32)
    running_var = jnp.ones((cout,), jnp.float32)
    scale = gamma / jnp.sqrt(running_var + eps)
    bias = beta - running_mean * scale
    wT_scaled = w.T * scale[:, None]                    # fold BN scale into weights (f32)
    return {
        "wTm": wT_scaled[:, :c_fm].astype(jnp.bfloat16),
        "wTn": wT_scaled[:, c_fm:].astype(jnp.bfloat16),
        "bias": bias.reshape(cout, 1).astype(jnp.float32),
    }


def cat_wo_sf_forward(inputs_a, inputs_b, params_u_fpn, params_fpn_u):
    """Cat_wo_sf.forward."""
    out_a, out_b = [], []
    for i in range(len(params_u_fpn)):
        # Cat_u_fpn[i] = Cat_adaptive(inu_ch[i], in_ch[i]) applied to (a_i, b_i)
        a_hat = cat_adaptive_apply(inputs_a[i], inputs_b[i], params_u_fpn[i])
        # Cat_fpn_u[i] = Cat_adaptive(in_ch[i], inu_ch[i]) applied to (b_i, a_i)
        b_hat = cat_adaptive_apply(inputs_b[i], inputs_a[i], params_fpn_u[i])
        out_a.append(a_hat)
        out_b.append(b_hat)
    out_a.append(inputs_a[3])
    return tuple(out_a), tuple(out_b)


# --------------------------------- main --------------------------------------

if __name__ == "__main__":
    key = jax.random.PRNGKey(0)

    # small synthetic config
    in_channels = [8, 16, 32, 32]      # branch "a" (FPN) channels, 4 levels
    inu_channels = [4, 8, 16]          # branch "b" (UNet) channels, 3 levels
    N = 2
    a_spatial = [32, 16, 8, 4]
    b_spatial = [16, 8, 4]

    keys = jax.random.split(key, 32)
    ki = iter(keys)

    inputs_a = [
        jax.random.normal(next(ki), (N, in_channels[i], a_spatial[i], a_spatial[i]),
                          jnp.float32)
        for i in range(4)
    ]
    inputs_b = [
        jax.random.normal(next(ki), (N, inu_channels[i], b_spatial[i], b_spatial[i]),
                          jnp.float32)
        for i in range(3)
    ]

    params_u_fpn = [
        make_cat_adaptive_params(next(ki), inu_channels[i], in_channels[i])
        for i in range(3)
    ]
    params_fpn_u = [
        make_cat_adaptive_params(next(ki), in_channels[i], inu_channels[i])
        for i in range(3)
    ]

    out_a, out_b = cat_wo_sf_forward(inputs_a, inputs_b, params_u_fpn, params_fpn_u)
    jax.block_until_ready(out_a)
    jax.block_until_ready(out_b)

    # sanity: shapes follow the PyTorch module
    for i in range(3):
        assert out_a[i].shape == (N, in_channels[i], a_spatial[i], a_spatial[i])
        assert out_b[i].shape == (N, inu_channels[i], b_spatial[i], b_spatial[i])
    assert out_a[3].shape == inputs_a[3].shape

    print("KERNEL_OK")
</pallas_src>

<mosaic_0001>
module attributes {stable_mosaic.version = 11 : i64} {
  func.func @_conv1x1_bn_relu_kernel(%arg0: i32, %arg1: i32, %arg2: memref<1x8x1024xbf16, #tpu.memory_space<vmem>>, %arg3: memref<1x4x1024xbf16, #tpu.memory_space<vmem>>, %arg4: memref<8x8xbf16, #tpu.memory_space<vmem>>, %arg5: memref<8x4xbf16, #tpu.memory_space<vmem>>, %arg6: memref<8x1xf32, #tpu.memory_space<vmem>>, %arg7: memref<1x8x1024xf32, #tpu.memory_space<vmem>>) attributes {dimension_semantics = [#tpu.dimension_semantics<parallel>, #tpu.dimension_semantics<parallel>], iteration_bounds = array<i64: 2, 1>, scalar_prefetch = 0 : i64, scratch_operands = 0 : i64, tpu.core_type = #tpu.core_type<tc>, window_params = [{transform_indices = @transform_0, window_bounds = array<i64: 1, 8, 1024>}, {transform_indices = @transform_1, window_bounds = array<i64: 1, 4, 1024>}, {pipeline_mode = #tpu.pipeline_mode<synchronous>, transform_indices = @transform_2, window_bounds = array<i64: 8, 8>}, {pipeline_mode = #tpu.pipeline_mode<synchronous>, transform_indices = @transform_3, window_bounds = array<i64: 8, 4>}, {pipeline_mode = #tpu.pipeline_mode<synchronous>, transform_indices = @transform_4, window_bounds = array<i64: 8, 1>}, {transform_indices = @transform_5, window_bounds = array<i64: 1, 8, 1024>}]} {
    %c0 = arith.constant 0 : index
    %c0_0 = arith.constant 0 : index
    %c0_1 = arith.constant 0 : index
    %0 = vector.load %arg2[%c0, %c0_0, %c0_1] : memref<1x8x1024xbf16, #tpu.memory_space<vmem>>, vector<1x8x1024xbf16>
    %1 = vector.shape_cast %0 : vector<1x8x1024xbf16> to vector<8x1024xbf16>
    %c0_2 = arith.constant 0 : index
    %c0_3 = arith.constant 0 : index
    %c0_4 = arith.constant 0 : index
    %2 = vector.load %arg3[%c0_2, %c0_3, %c0_4] : memref<1x4x1024xbf16, #tpu.memory_space<vmem>>, vector<1x4x1024xbf16>
    %3 = vector.shape_cast %2 : vector<1x4x1024xbf16> to vector<4x1024xbf16>
    %c0_5 = arith.constant 0 : index
    %c0_6 = arith.constant 0 : index
    %4 = vector.load %arg4[%c0_5, %c0_6] : memref<8x8xbf16, #tpu.memory_space<vmem>>, vector<8x8xbf16>
    %cst = arith.constant dense<0.000000e+00> : vector<8x1024xf32>
    %5 = tpu.matmul %4, %1, %cst {dimension_numbers = #tpu.dot_dimension_numbers<[1], [0], [0], [1], [0, 0, 1, 1], [], []>} : vector<8x8xbf16>, vector<8x1024xbf16>, vector<8x1024xf32> -> vector<8x1024xf32>
    %c0_7 = arith.constant 0 : index
    %c0_8 = arith.constant 0 : index
    %6 = vector.load %arg5[%c0_7, %c0_8] : memref<8x4xbf16, #tpu.memory_space<vmem>>, vector<8x4xbf16>
    %cst_9 = arith.constant dense<0.000000e+00> : vector<8x1024xf32>
    %7 = tpu.matmul %6, %3, %cst_9 {dimension_numbers = #tpu.dot_dimension_numbers<[1], [0], [0], [1], [0, 0, 1, 1], [], []>} : vector<8x4xbf16>, vector<4x1024xbf16>, vector<8x1024xf32> -> vector<8x1024xf32>
    %8 = arith.addf %5, %7 : vector<8x1024xf32>
    %c0_10 = arith.constant 0 : index
    %c0_11 = arith.constant 0 : index
    %9 = vector.load %arg6[%c0_10, %c0_11] : memref<8x1xf32, #tpu.memory_space<vmem>>, vector<8x1xf32>
    %10 = vector.broadcast %9 : vector<8x1xf32> to vector<8x1024xf32>
    %11 = arith.addf %8, %10 : vector<8x1024xf32>
    %cst_12 = arith.constant 0.000000e+00 : f32
    %12 = vector.broadcast %cst_12 : f32 to vector<8x1024xf32>
    %13 = arith.maximumf %11, %12 : vector<8x1024xf32>
    %c0_13 = arith.constant 0 : index
    %c0_14 = arith.constant 0 : index
    %c0_15 = arith.constant 0 : index
    %14 = vector.load %arg7[%c0_13, %c0_14, %c0_15] : memref<1x8x1024xf32, #tpu.memory_space<vmem>>, vector<1x8x1024xf32>
    %15 = vector.shape_cast %14 : vector<1x8x1024xf32> to vector<8x1024xf32>
    %16 = vector.shape_cast %13 : vector<8x1024xf32> to vector<1x8x1024xf32>
    tpu.vector_store %arg7[%c0_13, %c0_14, %c0_15], %16 {strides = array<i32>} : memref<1x8x1024xf32, #tpu.memory_space<vmem>>, vector<1x8x1024xf32>,
    return
  }
  func.func @transform_0(%arg0: i32, %arg1: i32) -> (i32, i32, i32) {
    %c0_i32 = arith.constant 0 : i32
    %c0_i32_0 = arith.constant 0 : i32
    return %arg0, %c0_i32, %arg1 : i32, i32, i32
  }
  func.func @transform_1(%arg0: i32, %arg1: i32) -> (i32, i32, i32) {
    %c0_i32 = arith.constant 0 : i32
    %c0_i32_0 = arith.constant 0 : i32
    return %arg0, %c0_i32, %arg1 : i32, i32, i32
  }
  func.func @transform_2(%arg0: i32, %arg1: i32) -> (i32, i32) {
    %c0_i32 = arith.constant 0 : i32
    %c0_i32_0 = arith.constant 0 : i32
    %c0_i32_1 = arith.constant 0 : i32
    return %c0_i32, %c0_i32_0 : i32, i32
  }
  func.func @transform_3(%arg0: i32, %arg1: i32) -> (i32, i32) {
    %c0_i32 = arith.constant 0 : i32
    %c0_i32_0 = arith.constant 0 : i32
    %c0_i32_1 = arith.constant 0 : i32
    return %c0_i32, %c0_i32_0 : i32, i32
  }
  func.func @transform_4(%arg0: i32, %arg1: i32) -> (i32, i32) {
    %c0_i32 = arith.constant 0 : i32
    %c0_i32_0 = arith.constant 0 : i32
    %c0_i32_1 = arith.constant 0 : i32
    return %c0_i32, %c0_i32_0 : i32, i32
  }
  func.func @transform_5(%arg0: i32, %arg1: i32) -> (i32, i32, i32) {
    %c0_i32 = arith.constant 0 : i32
    %c0_i32_0 = arith.constant 0 : i32
    return %arg0, %c0_i32, %arg1 : i32, i32, i32
  }
}

</mosaic_0001>

<bundles_post_ra>
// kernel: tpu_custom_call.1
= control target key start
LH: loop header
LB: loop body
LE: loop exit
PB: predicated region body
PF: predicated region fallthrough
CT: control target
= control target key end

     0   :  { %s1435_s0 = inlined_call_operand.hbm [shape: bf16[2,8,1024], index: 0, kind: input, shape index: {}]   ;;  %s1436_s1 = inlined_call_operand.hbm [shape: bf16[2,4,1024], index: 1, kind: input, shape index: {}]   ;;  %s1437_s2 = inlined_call_operand.vmem [shape: bf16[8,8], index: 2, kind: input, shape index: {}]   ;;  %s1438_s3 = inlined_call_operand.vmem [shape: bf16[8,4], index: 3, kind: input, shape index: {}]   ;;  %s1439_s4 = inlined_call_operand.vmem [shape: f32[8,1], index: 4, kind: input, shape index: {}]   ;;  %s1440_s5 = inlined_call_operand.hbm [shape: f32[2,8,1024], index: 5, kind: output, shape index: {}]  }
   0x1   :  { %1441 = sst [smem:[#allocation11_spill]] %s1435_s0 }
   0x2   :  { %10 = vsyncpa [#allocation3], 0 }
   0x3   :  { %12 = vsyncpa [#allocation3 + $0x1], 0 }
   0x4   :  { %13 = vsyncpa [#allocation6], 0 }
   0x5   :  { %15 = vsyncpa [#allocation6 + $0x1], 0 }
   0x6   :  { %16 = vsyncpa [#allocation4], 0 }
   0x7   :  { %18 = vsyncpa [#allocation4 + $0x1], 0  ;;  %s1215_s18 = smov 0   ;;  %s1217_s19 = smov 0  }
   0x8   :  { %s1219_s20 = smov 0   ;;  %s1221_s21 = smov 0  }
   0x9   :  { %s1223_s22 = smov 0   ;;  %s1225_s23 = smov 0  }
   0xa LB: > { %s912_s24 = sadd.s32 4294967295, %s1178_s23   ;;  %s913_s25 = sadd.s32 4294967294, %s1178_s23   ;;  %s1178_s23 = sphi %s1225_s23, %s24_s23   ;;  %s1174_s22 = sphi %s1223_s22, %s1454_s22   ;;  %s1170_s21 = sphi %s1221_s21, %s1453_s21   ;;  %s1166_s20 = sphi %s1219_s20, %s1452_s20   ;;  %s1162_s19 = sphi %s1217_s19, %s1451_s19   ;;  %s1158_s18 = sphi %s1215_s18, %s1450_s18  }
   0xb   : > { %s36_s26 = sadd.s32 1, %s1174_s22  ;;  %s45_s27 = sadd.s32 1, %s1166_s20 }
   0xc   : > { %p38_p0 = scmp.ge.s32.totalorder %s36_s26, 2  ;;  %p52_p1 = scmp.ne.s32.totalorder %s1166_s20, %s1162_s19 }
   0xd   : > { %p53_p2 = scmp.eq.s32.totalorder %s1178_s23, 0  ;;  %p58_p3 = scmp.ne.s32.totalorder %s1162_s19, %s1158_s18 }
   0xe   : > { %s1456_s26 = smov (%p38_p0, %s36_s26), 0  ;;  %p59_p5 = scmp.eq.s32.totalorder %s912_s24, 0 }
   0xf   : > { %p1256_p4 = por %p53_p2, %p52_p1  ;;  %s40_s29 = ssub.s32 %s1174_s22, %s1456_s26 }
  0x10   : > { %p175_p6 = scmp.eq.s32.totalorder %s912_s24, 1  ;;  %p43_p7 = scmp.eq.s32.totalorder %s40_s29, 0 }
  0x11   : > { %p1262_p8 = por %p59_p5, %p58_p3  ;;  %p181_p10 = scmp.eq.s32.totalorder %s913_s25, 1 }
  0x12   : > { %p1266_p9 = por %p175_p6, %p52_p1  ;;  %p975_p13 = scmp.lt.s32.totalorder %s1178_s23, 2 }
  0x13   : > { %s1271_s7 = scalar_select %p43_p7, %s1166_s20, %s45_s27  }
  0x14   : > { %p1273_p11 = por %p181_p10, %p58_p3  ;;  %s1280_s9 = sand.u32 1, %s1166_s20  }
  0x15   : > { %s916_s10 = sshll.u32 %s1280_s9, 5  ;;  %s955_s11 = sshll.u32 %s1174_s22, 9 }
  0x16   : > { %s1446_s0 = sld [smem:[#allocation11_spill]]  ;;  %s214_s15 = scalar_lea.vmem [#allocation2], %s916_s10 }
  0x17   : > { %s224_s16 = sshll.u32 %s214_s15, 4  ;;  %p1289_p0 = pnand %p975_p13, %p1256_p4  ;;  %s225_s16 = int_to_ptr.vmem [resolvable:$true] %s224_s16 }
  0x18   : > { %p922_p1 = scmp.ge.s32.totalorder %s1178_s23, 1  ;;  %p250_p2 = scmp.lt.s32.totalorder %s1178_s23, 3 }
  0x19   : > { %s211_s24 = scalar_lea.sflag [#allocation3], %s1280_s9  ;;  %p1040_p3 = pneg %p1289_p0 }
  0x1a   : > { %s1051_s25 = scalar_lea.vmem %s225_s16, 512  ;;  %s1180_s27 = smov [#allocation2]  }
  0x1b   : > { %p1052_p5 = scmp.ne.s32.totalorder %s225_s16, %s1051_s25  ;;  %s1056_s29 = sshll.u32 %s1180_s27, 4  ;;  %s1057_s29 = int_to_ptr.vmem [resolvable:$false] %s1056_s29 }
  0x1c   : > { %s222_s14 = scalar_lea.hbm %s1446_s0, %s955_s11  ;;  %s1058_s28 = scalar_lea.vmem %s1057_s29, 1024 }
  0x1d   : > { %p1054_p6 = pnand %p1052_p5, %p1040_p3  ;;  %p1059_p4 = scmp.lt.s32.totalorder %s225_s16, %s1057_s29 }
  0x1e   : > { %p1060_p10 = scmp.lt.s32.totalorder %s1058_s28, %s1051_s25 }
  0x1f   : > { %p1055_p7 = pneg %p1054_p6 }
  0x20   : > { %p1061_p13 = por %p1060_p10, %p1059_p4 }
  0x22   : > { %p1062_p12 = pnand %p1061_p13, %p1055_p7 }
  0x24   : > { %1065 = shalt.err (!%p1062_p12)
}
  0x25   : > { %967 = dma.hbm_to_vmem [thread:$0]  (!%p1289_p0), %s222_s14, 512, %s225_s16, %s211_s24  }
  0x26   : > { %p1307_p5 = pnand %p922_p1, %p250_p2  ;;  %s919_s11 = sshll.u32 %s1280_s9, 4 }
  0x27   : > { %s956_s12 = sshll.u32 %s1174_s22, 8  ;;  %s235_s27 = scalar_lea.vmem [#allocation5], %s919_s11 }
  0x28   : > { %s243_s25 = scalar_lea.hbm %s1436_s1, %s956_s12  ;;  %s245_s29 = sshll.u32 %s235_s27, 4  ;;  %s246_s29 = int_to_ptr.vmem [resolvable:$true] %s245_s29 }
  0x29   : > { %s232_s28 = scalar_lea.sflag [#allocation6], %s1280_s9  ;;  %s1079_s0 = scalar_lea.vmem %s246_s29, 256 }
  0x2a   : > { %p1080_p12 = scmp.ne.s32.totalorder %s246_s29, %s1079_s0  ;;  %s1181_s14 = smov [#allocation5]  }
  0x2b   : > { %s1084_s16 = sshll.u32 %s1181_s14, 4  ;;  %s1085_s16 = int_to_ptr.vmem [resolvable:$false] %s1084_s16 }
  0x2c   : > { %p1082_p6 = pnand %p1080_p12, %p1040_p3  ;;  %s1086_s24 = scalar_lea.vmem %s1085_s16, 512 }
  0x2d   : > { %p1087_p1 = scmp.lt.s32.totalorder %s246_s29, %s1085_s16  ;;  %p1088_p2 = scmp.lt.s32.totalorder %s1086_s24, %s1079_s0 }
  0x2e   : > { %p1083_p7 = pneg %p1082_p6 }
  0x2f   : > { %p1089_p4 = por %p1088_p2, %p1087_p1 }
  0x31   : > { %p1090_p10 = pnand %p1089_p4, %p1083_p7 }
  0x33   : > { %1093 = shalt.err (!%p1090_p10)
}
  0x34   : > { %970 = dma.hbm_to_vmem [thread:$0]  (!%p1289_p0), %s243_s25, 256, %s246_s29, %s232_s28  }
  0x35   : > { %254 = sbr.rel (%p1307_p5) target bundleno = 315 (0x13b), region = 40  ;;  %s1325_s9 = sand.u32 (!%p1307_p5), 1, %s1162_s19  }
  0x36   : > { %s923_s11 = sshll.u32 (!%p1307_p5), %s1325_s9, 5  ;;  %s257_s12 = scalar_lea.sflag (!%p1307_p5), [#allocation3], %s1325_s9 }
  0x37   : > { %s1329_s13 = scalar_lea.vmem (!%p1307_p5), [#allocation2], %s923_s11 }
  0x3a   : > { %1145 = dma.done.wait (%p1262_p8), %s257_s12, 512  }
  0x3b   : > { %1147 = vsyncadd (%p1262_p8), %s257_s12, 4294966784  ;;  %s924_s0 = sshll.u32 %s1325_s9, 4  ;;  %s266_s17 = scalar_lea.sflag [#allocation6], %s1325_s9 }
  0x3c   : > { %s269_s10 = scalar_lea.vmem [#allocation5], %s924_s0 }
  0x3d   : > { %1149 = dma.done.wait (%p1262_p8), %s266_s17, 256  }
  0x3e   : > { %1151 = vsyncadd (%p1262_p8), %s266_s17, 4294967040  ;;  %v319_v0 = vlaneseq  ;;  %v1182_v1 = vmov 1983009808   ;;  %v1183_v3 = vmov 0   ;;  %v309_v7 = vld [vmem:[%s269_s10] sm:$0xff]  ;;  %vm353_vm0 = vcmask 1041408  }
  0x3f   : > { %v317_v2 = vunpack.c.l.s4 %v1182_v1  ;;  %410 = vmatprep.mubr.bf16.mxu0 %v1183_v3  ;;  %451 = vmatprep.mubr.bf16.mxu1 %v1183_v3  ;;  %v310_v8 = vld [vmem:[%s269_s10 + $0x8] sm:$0xff]  ;;  %v315_v10 = vcombine.high %v309_v7, %v309_v7  ;;  %v755_v13 = vld [vmem:[%s1439_s4] sm:$0xff]  ;;  %vm349_vm1 = vcmask 31744   ;;  %vm566_vm2 = vcmask 1043456   ;;  %v307_v30 = vld [vmem:[%s1329_s13 + $0x10] sm:$0xff]  ;;  %s925_s14 = sshll.u32 %s1325_s9, 6 }
  0x40   : > { %v320_v4 = vshrl.u32 %v319_v0, 7  ;;  %1027 = vset.pattern.permute.xlu0 %v1183_v3  ;;  %v332_v12 = vcombine.high %v310_v8, %v310_v8  ;;  %v305_v19 = vld [vmem:[%s1329_s13] sm:$0xff]  ;;  %v306_v24 = vld [vmem:[%s1329_s13 + $0x8] sm:$0xff]  ;;  %v308_v32 = vld [vmem:[%s1329_s13 + $0x18] sm:$0xff]  ;;  %v939_v34 = vcombine.high %v307_v30, %v307_v30  ;;  %v938_v37 = vcombine.low %v307_v30, %v307_v30  ;;  %s1384_s16 = scalar_lea.vmem [#allocation7], %s925_s14  ;;  %s957_s24 = sshll.u32 %s1170_s21, 10 }
  0x41   : > { %v318_v5 = vunpack.c.0.s8 %v317_v2  ;;  %758 = vperm.xlu0 %1027, %v755_v13   ;;  %v312_v22 = vld [vmem:[%s1438_s3] sm:$0xf]  ;;  %v935_v26 = vcombine.high %v305_v19, %v305_v19  ;;  %v937_v28 = vcombine.high %v306_v24, %v306_v24  ;;  %v934_v29 = vcombine.low %v305_v19, %v305_v19  ;;  %s802_s11 = sshll.u32 %s1384_s16, 4  ;;  %s800_s0 = scalar_lea.hbm %s1440_s5, %s957_s24  ;;  %s803_s11 = int_to_ptr.vmem [resolvable:$true] %s802_s11 }
  0x42   : > { %v936_v31 = vcombine.low %v306_v24, %v306_v24  ;;  %v941_v36 = vcombine.high %v308_v32, %v308_v32  ;;  %v940_v38 = vcombine.low %v308_v32, %v308_v32  ;;  %v311_v39 = vld [vmem:[%s1437_s2] sm:$0xf]  ;;  %vm562_vm3 = vcmask 64512   ;;  %s786_s17 = scalar_lea.sflag [#allocation4], %s1325_s9  ;;  %s1094_s10 = scalar_lea.vmem %s803_s11, 1024 }
  0x43   : > { %v321_v6 = vsub.s32 %v318_v5, %v320_v4  ;;  %v568_v33 = vsel %vm566_vm2, %v934_v29, 0  ;;  %v580_v40 = vsel %vm566_vm2, %v938_v37, 0  ;;  %p1095_p8 = scmp.ne.s32.totalorder %s803_s11, %s1094_s10  ;;  %s1184_s21 = smov [#allocation7]  }
  0x44   : > { %v574_v35 = vsel %vm566_vm2, %v936_v31, 0  ;;  %v586_v41 = vsel %vm566_vm2, %v940_v38, 0  ;;  %s1098_s30 = sshll.u32 %s1184_s21, 4  ;;  %s1099_s30 = int_to_ptr.vmem [resolvable:$false] %s1098_s30 }
  0x45   : > { %v322_v9 = vrot.slane %v309_v7, %v321_v6  ;;  %v339_v11 = vrot.slane %v310_v8, %v321_v6  ;;  %v329_v16 = vrot.slane %v315_v10, %v321_v6  ;;  %v346_v18 = vrot.slane %v332_v12, %v321_v6  ;;  %p1096_p0 = pnand %p1095_p8, %p1266_p9  ;;  %s1100_s15 = scalar_lea.vmem %s1099_s30, 2048 }
  0x46   : > { %p1101_p13 = scmp.lt.s32.totalorder %s803_s11, %s1099_s30  ;;  %p1102_p5 = scmp.lt.s32.totalorder %s1100_s15, %s1094_s10 }
  0x47   : > { %v330_v14 = vcombine.high %v322_v9, %v322_v9  ;;  %v355_v15 = vsel %vm353_vm0, %v322_v9, 0  ;;  %v347_v17 = vcombine.high %v339_v11, %v339_v11  ;;  %v331_v20 = vcombine.high %v329_v16, %v329_v16  ;;  %p1097_p3 = pneg %p1096_p0 }
  0x48   : > { %v361_v21 = vsel %vm353_vm0, %v329_v16, 0  ;;  %v348_v23 = vcombine.high %v346_v18, %v346_v18  ;;  %v367_v25 = vsel %vm353_vm0, %v339_v11, 0  ;;  %v373_v27 = vsel %vm353_vm0, %v346_v18, 0  ;;  %p1103_p12 = por %p1102_p5, %p1101_p13 }
  0x49   : > { %926 = vmatprep.subr.msk.bf16.mxu0 %vm353_vm0, %v330_v14  ;;  %928 = vmatprep.subr.msk.bf16.mxu1 %vm353_vm0, %v331_v20 }
  0x4a   : > { %393 = vmatpush1.bf16.msra.mxu0 %v355_v15  ;;  %434 = vmatpush1.bf16.msra.mxu1 %v361_v21  ;;  %p1104_p6 = pnand %p1103_p12, %p1097_p3 }
  0x4b   : > { %930 = vmatprep.subr.msk.bf16.mxu0 %vm353_vm0, %v347_v17  ;;  %932 = vmatprep.subr.msk.bf16.mxu1 %vm353_vm0, %v348_v23 }
  0x4d   : > { %927 = vmatmul.mubr.msk.bf16.vlgmr.msra.gmra.mxu0 %vm349_vm1, %v312_v22  ;;  %929 = vmatmul.mubr.msk.bf16.vlgmr.msra.gmra.mxu1 %vm349_vm1, %v312_v22 }
  0x4e   : > { %475 = vmatpush1.bf16.msra.mxu0 %v367_v25  ;;  %492 = vmatprep.mubr.bf16.mxu0 %v1183_v3 }
  0x4f   : > { %942 = vmatprep.subr.msk.bf16.mxu0 %vm566_vm2, %v935_v26  ;;  %516 = vmatpush1.bf16.msra.mxu1 %v373_v27 }
  0x50   : > { %533 = vmatprep.mubr.bf16.mxu1 %v1183_v3  ;;  %944 = vmatprep.subr.msk.bf16.mxu1 %vm566_vm2, %v937_v28 }
  0x55   : > { %931 = vmatmul.mubr.msk.bf16.vlgmr.msra.gmra.mxu0 %vm349_vm1, %v312_v22  ;;  %933 = vmatmul.mubr.msk.bf16.vlgmr.msra.gmra.mxu1 %vm349_vm1, %v312_v22 }
  0x56   : > { %606 = vmatpush1.bf16.msra.mxu0 %v568_v33  ;;  %623 = vmatprep.mubr.bf16.mxu0 %v1183_v3 }
  0x57   : > { %946 = vmatprep.subr.msk.bf16.mxu0 %vm566_vm2, %v939_v34  ;;  %647 = vmatpush1.bf16.msra.mxu1 %v574_v35 }
  0x58   : > { %664 = vmatprep.mubr.bf16.mxu1 %v1183_v3  ;;  %948 = vmatprep.subr.msk.bf16.mxu1 %vm566_vm2, %v941_v36 }
  0x5d   : > { %943 = vmatmul.mubr.msk.bf16.vlgmr.msra.gmra.mxu0 %vm562_vm3, %v311_v39  ;;  %945 = vmatmul.mubr.msk.bf16.vlgmr.msra.gmra.mxu1 %vm562_vm3, %v311_v39 }
  0x5e   : > { %688 = vmatpush1.bf16.msra.mxu0 %v580_v40  ;;  %705 = vmatprep.mubr.bf16.mxu0 %v1183_v3 }
  0x5f   : > { %729 = vmatpush1.bf16.msra.mxu1 %v586_v41  ;;  %746 = vmatprep.mubr.bf16.mxu1 %v1183_v3 }
  0x65   : > { %947 = vmatmul.mubr.msk.bf16.vlgmr.msra.gmra.mxu0 %vm562_vm3, %v311_v39  ;;  %949 = vmatmul.mubr.msk.bf16.vlgmr.msra.gmra.mxu1 %vm562_vm3, %v311_v39 }
  0xbc   : > { %v759_v57 = vpop.permute.xlu0 %758 }
 0x10d   : > { %v412_v42 = vpop.f32.mrf.mxu0  ;;  %v453_v44 = vpop.f32.mrf.mxu1 }
 0x10f   : > { %v414_v43 = vpop.f32.mrf.mxu0  ;;  %v455_v46 = vpop.f32.mrf.mxu1 }
 0x111   : > { %v416_v45 = vpop.f32.mrf.mxu0  ;;  %v457_v48 = vpop.f32.mrf.mxu1 }
 0x113   : > { %v417_v47 = vpop.f32.mrf.mxu0  ;;  %v458_v49 = vpop.f32.mrf.mxu1 }
 0x115   : > { %v494_v50 = vpop.f32.mrf.mxu0  ;;  %v535_v52 = vpop.f32.mrf.mxu1 }
 0x117   : > { %v496_v51 = vpop.f32.mrf.mxu0  ;;  %v537_v54 = vpop.f32.mrf.mxu1 }
 0x119   : > { %v498_v53 = vpop.f32.mrf.mxu0  ;;  %v539_v56 = vpop.f32.mrf.mxu1 }
 0x11b   : > { %v499_v55 = vpop.f32.mrf.mxu0  ;;  %v540_v58 = vpop.f32.mrf.mxu1 }
 0x11d   : > { %v625_v59 = vpop.f32.mrf.mxu0  ;;  %v666_v62 = vpop.f32.mrf.mxu1 }
 0x11e   : > { %v626_v60 = vadd.f32 %v625_v59, %v412_v42  ;;  %v667_v1 = vadd.f32 %v666_v62, %v453_v44 }
 0x11f   : > { %v627_v61 = vpop.f32.mrf.mxu0  ;;  %v668_v3 = vpop.f32.mrf.mxu1 }
 0x120   : > { %v761_v63 = vadd.f32 %v759_v57, %v626_v60  ;;  %v628_v0 = vadd.f32 %v627_v61, %v414_v43  ;;  %v763_v6 = vadd.f32 %v759_v57, %v667_v1  ;;  %v669_v7 = vadd.f32 %v668_v3, %v455_v46 }
 0x121   : > { %v629_v2 = vpop.f32.mrf.mxu0  ;;  %v670_v9 = vpop.f32.mrf.mxu1 }
 0x122   : > { %v769_v4 = vmax.f32 %v761_v63, 0.0  ;;  %v762_v5 = vadd.f32 %v759_v57, %v628_v0  ;;  %v771_v11 = vmax.f32 %v763_v6, 0.0  ;;  %v764_v12 = vadd.f32 %v759_v57, %v669_v7 }
 0x123   : > { %v630_v8 = vpop.f32.mrf.mxu0  ;;  %v671_v13 = vpop.f32.mrf.mxu1 }
 0x124   : > { %777 = vst [vmem:[%s1384_s16] sm:$0xff] %v769_v4  ;;  %v770_v10 = vmax.f32 %v762_v5, 0.0  ;;  %779 = vst [vmem:[%s1384_s16 + $0x10] sm:$0xff] %v771_v11  ;;  %v772_v15 = vmax.f32 %v764_v12, 0.0 }
 0x125   : > { %v707_v14 = vpop.f32.mrf.mxu0  ;;  %v748_v18 = vpop.f32.mrf.mxu1 }
 0x126   : > { %778 = vst [vmem:[%s1384_s16 + $0x8] sm:$0xff] %v770_v10  ;;  %v708_v16 = vadd.f32 %v707_v14, %v494_v50  ;;  %780 = vst [vmem:[%s1384_s16 + $0x18] sm:$0xff] %v772_v15  ;;  %v749_v21 = vadd.f32 %v748_v18, %v535_v52 }
 0x127   : > { %v709_v17 = vpop.f32.mrf.mxu0  ;;  %v750_v23 = vpop.f32.mrf.mxu1 }
 0x128   : > { %v765_v19 = vadd.f32 %v759_v57, %v708_v16  ;;  %v710_v20 = vadd.f32 %v709_v17, %v496_v51  ;;  %v767_v26 = vadd.f32 %v759_v57, %v749_v21  ;;  %v751_v27 = vadd.f32 %v750_v23, %v537_v54 }
 0x129   : > { %v711_v22 = vpop.f32.mrf.mxu0  ;;  %v752_v29 = vpop.f32.mrf.mxu1 }
 0x12a   : > { %v773_v24 = vmax.f32 %v765_v19, 0.0  ;;  %v766_v25 = vadd.f32 %v759_v57, %v710_v20  ;;  %v775_v31 = vmax.f32 %v767_v26, 0.0  ;;  %v768_v32 = vadd.f32 %v759_v57, %v751_v27 }
 0x12b   : > { %v712_v28 = vpop.f32.mrf.mxu0  ;;  %v753_v33 = vpop.f32.mrf.mxu1 }
 0x12c   : > { %781 = vst [vmem:[%s1384_s16 + $0x20] sm:$0xff] %v773_v24  ;;  %v774_v30 = vmax.f32 %v766_v25, 0.0  ;;  %783 = vst [vmem:[%s1384_s16 + $0x30] sm:$0xff] %v775_v31  ;;  %v776_v34 = vmax.f32 %v768_v32, 0.0 }
 0x12e   : > { %782 = vst [vmem:[%s1384_s16 + $0x28] sm:$0xff] %v774_v30  ;;  %784 = vst [vmem:[%s1384_s16 + $0x38] sm:$0xff] %v776_v34 }
 0x12f   : > { %1107 = shalt.err (!%p1104_p6)
}
 0x130   : > { %s1108_s25 = scalar_lea.hbm %s800_s0, 1024  ;;  %s1112_s29 = scalar_lea.hbm %s1440_s5, 2048 }
 0x131   : > { %p1109_p7 = scmp.ne.s32.totalorder %s800_s0, %s1108_s25  ;;  %p1113_p4 = scmp.lt.s32.totalorder %s800_s0, %s1440_s5 }
 0x132   : > { %p1114_p10 = scmp.lt.s32.totalorder %s1112_s29, %s1108_s25 }
 0x133   : > { %p1110_p1 = pnand %p1109_p7, %p1266_p9 }
 0x134   : > { %p1115_p8 = por %p1114_p10, %p1113_p4 }
 0x135   : > { %p1111_p2 = pneg %p1110_p1 }
 0x137   : > { %p1116_p0 = pnand %p1115_p8, %p1111_p2 }
 0x139   : > { %1119 = shalt.err (!%p1116_p0)
}
 0x13a   : > { %962 = dma.vmem_to_hbm [thread:$0]  (%p1266_p9), %s803_s11, 1024, %s800_s0, %s786_s17  }
 0x13b PF: > { %s814_s16 = sand.u32 1, %s1158_s18   ;;  %p1449_p3 = scmp.ge.s32.totalorder %s1178_s23, 2 }
 0x13c   : > { %s815_s24 = scalar_lea.sflag [#allocation4], %s814_s16 }
 0x13d   : > { %p972_p13 = pnand %p1449_p3, %p1273_p11 }
 0x13f   : > { %p973_p5 = pneg %p972_p13 }
 0x141   : > { %1153 = dma.done.wait (%p973_p5), %s815_s24, 1024  }
 0x142   : > { %1155 = vsyncadd (%p973_p5), %s815_s24, 4294966272  ;;  %s24_s23 = sadd.s32 1, %s1178_s23   ;;  %s1450_s18 = smov %s1162_s19 }
 0x143   : > { %p21_p12 = scmp.ge.s32.totalorder %s24_s23, 4   ;;  %s1451_s19 = smov %s1166_s20 }
 0x144   : > { %s1452_s20 = smov %s1271_s7  ;;  %s1453_s21 = smov %s1174_s22 }
 0x145   : > { %s1454_s22 = smov %s1456_s26  ;;  %23 = sbr.rel (!%p21_p12) target bundleno = 10 (0xa), region = 98 }
 0x14a   :  { %820 = vsyncpa [#allocation3], 1 }
 0x14b   :  { %822 = vsyncpa [#allocation3 + $0x1], 1 }
 0x14c   :  { %823 = vsyncpa [#allocation6], 1 }
 0x14d   :  { %825 = vsyncpa [#allocation6 + $0x1], 1 }
 0x14e   :  { %826 = vsyncpa [#allocation4], 1 }
 0x14f   :  { %828 = vsyncpa [#allocation4 + $0x1], 1 }

</bundles_post_ra>
